<compile_context>
chip_gen: v7x
topology: tpu7x:2x2x1
jax: 0.10.0
libtpu: 0.0.40
codegen_flags: <defaults>
</compile_context>

<pallas_src>
import functools

import jax
import jax.numpy as jnp
from jax import lax
from jax.experimental import pallas as pl
from jax.experimental.pallas import tpu as pltpu
import numpy as np


def _pad8(c):
    return ((c + 7) // 8) * 8


def _res_block_kernel(x_ref, w1_ref, w2_ref, m_ref, o_ref, *, img_w, cin, cin_p):
    """One grid step = B images, (batch, spatial) flattened on the lane axis.

    x_ref : (cin, B*S)   f32  input activations (S = H*W, images lane-adjacent)
    w1_ref: (cmid_p, 9*cin_p)          bf16 conv1 slab, K order = (ky*3+kx)*cin_p + c
    w2_ref: (cout_p, 9*cmid_p + cin_p) bf16 conv2 slab with 1x1 expand rows appended
    m_ref : (4, S)       bf16 edge masks: [col>=1, col<=W-2, row>=1, row<=H-2]
    o_ref : (cout_p, B*S) f32
    """
    BS = x_ref.shape[1]
    S = m_ref.shape[1]

    # Period-S edge masks widened to the B*S lane axis (pure lane-concat of aligned
    # pieces; the (4, S) HBM block is grid-invariant, so it is fetched once).
    m = m_ref[...]
    if BS != S:
        m = jnp.concatenate([m] * (BS // S), axis=1)          # (4, B*S)
    mask_x = {0: m[0:1, :], 2: m[1:2, :]}                     # kx = 0 / 2
    mask_y = {0: m[2:3, :], 2: m[3:4, :]}                     # ky = 0 / 2

    def im2col(v):
        # 9 zero-padded 3x3 taps of v, each (c, B*S), K order (ky*3+kx)*c + channel.
        # Flat shift s = dy*W + dx is a static lane slice of a 128-lane zero-apron
        # buffer; column masks kill the in-row wrap at left/right image edges and the
        # row masks kill cross-image bleed at top/bottom edges.  Stays in vregs/VMEM,
        # no HBM round-trips.
        c = v.shape[0]
        apron = jnp.zeros((c, 128), v.dtype)
        buf = jnp.concatenate([apron, v, apron], axis=1)      # (c, B*S + 256)
        taps = []
        for ky in range(3):
            for kx in range(3):
                s = (ky - 1) * img_w + (kx - 1)
                t = buf[:, 128 + s:128 + s + BS]
                if ky != 1:
                    t = t * mask_y[ky]
                if kx != 1:
                    t = t * mask_x[kx]
                taps.append(t)
        return taps

    # bf16 MXU operands; channel pad to cin_p is done here in-register (no HBM pad).
    x = x_ref[...].astype(jnp.bfloat16)
    if cin_p != cin:
        x = jnp.concatenate([x, jnp.zeros((cin_p - cin, BS), jnp.bfloat16)], axis=0)

    # ---- conv1 + ReLU: one wide matmul (cmid_p, 9*cin_p) @ (9*cin_p, B*S), f32 acc ----
    p1 = jnp.concatenate(im2col(x), axis=0)
    h = jnp.dot(w1_ref[...], p1, preferred_element_type=jnp.float32)
    h = jnp.maximum(h, 0.0).astype(jnp.bfloat16)

    # ---- conv2 + fused 1x1 expand: identity-path rows (= x) appended to the K axis ----
    p2 = jnp.concatenate(im2col(h) + [x], axis=0)
    y = jnp.dot(w2_ref[...], p2, preferred_element_type=jnp.float32)
    o_ref[...] = y.astype(o_ref.dtype)


def make_weight_slabs(w1, w2, wexp):
    """Output-major bf16 weight slabs (hoist/reuse when the block is applied repeatedly).

    w1 : (3, 3, Cin, Cmid) HWIO ; w2 : (3, 3, Cmid, Cout) HWIO ; wexp : (Cin, Cout).
    """
    _, _, cin, cmid = w1.shape
    cout = w2.shape[3]
    cin_p, cmid_p, cout_p = _pad8(cin), _pad8(cmid), _pad8(cout)
    w1p = jnp.pad(w1, ((0, 0), (0, 0), (0, cin_p - cin), (0, cmid_p - cmid)))
    w1s = w1p.reshape(9 * cin_p, cmid_p).T.astype(jnp.bfloat16)         # (cmid_p, 9*cin_p)
    w2p = jnp.pad(w2, ((0, 0), (0, 0), (0, cmid_p - cmid), (0, cout_p - cout)))
    w2s = w2p.reshape(9 * cmid_p, cout_p).T                             # (cout_p, 9*cmid_p)
    wep = jnp.pad(wexp, ((0, cin_p - cin), (0, cout_p - cout))).T       # (cout_p, cin_p)
    w2cat = jnp.concatenate([w2s, wep], axis=1).astype(jnp.bfloat16)    # (cout_p, 9*cmid_p+cin_p)
    return w1s, w2cat


@jax.jit
def bn_residual_block(x_nchw, w1, w2, wexp):
    """Forward of _BN_Residual_Block (bn=False, last=True, groups=1).

    x_nchw : (N, Cin, H, W) f32 ; returns (N, Cout, H, W) f32.
    """
    N, Cin, H, W = x_nchw.shape
    Cmid, Cout = w1.shape[3], w2.shape[3]
    S = H * W
    assert S % 128 == 0, "lane-dense layout needs H*W to be a multiple of 128"
    assert W + 1 <= 128, "128-lane zero apron must cover the largest tap shift"
    Cin_p, Cmid_p, Cout_p = _pad8(Cin), _pad8(Cmid), _pad8(Cout)
    K2 = 9 * Cmid_p + Cin_p

    # Per-step image batch: large enough to amortize the ~0.35us/step grid overhead,
    # small enough for v7x's 64 MiB VMEM, and <= ceil(N/2) so the "parallel" grid keeps
    # >= 2 steps for both v7x TensorCores (a no-op on v5e/v6e).
    B = min(32, max(1, (N + 1) // 2))
    N_pad = -(-N // B) * B
    BS = B * S

    w1s, w2cat = make_weight_slabs(w1, w2, wexp)

    # Channels-first with (batch, spatial) flattened onto the lane axis: one XLA relayout
    # pass in HBM, after which every conv is a single wide MXU matmul per grid step.
    # No channel pad is materialised in HBM (it happens in-register inside the kernel).
    x = x_nchw.reshape(N, Cin, S)
    if N_pad != N:
        x = jnp.pad(x, ((0, N_pad - N), (0, 0), (0, 0)))
    x = jnp.transpose(x, (1, 0, 2)).reshape(Cin, N_pad * S)

    # Single grid-invariant edge-mask block (period S): [col>=1, col<=W-2, row>=1, row<=H-2].
    col = jnp.arange(S, dtype=jnp.int32) % W
    row = jnp.arange(S, dtype=jnp.int32) // W
    masks = jnp.stack([col >= 1, col <= W - 2, row >= 1, row <= H - 2]).astype(jnp.bfloat16)

    kernel = functools.partial(_res_block_kernel, img_w=W, cin=Cin, cin_p=Cin_p)
    out = pl.pallas_call(
        kernel,
        out_shape=jax.ShapeDtypeStruct((Cout_p, N_pad * S), x_nchw.dtype),
        grid=(N_pad // B,),
        in_specs=[
            pl.BlockSpec((Cin, BS), lambda n: (0, n)),             # activations (B images)
            pl.BlockSpec((Cmid_p, 9 * Cin_p), lambda n: (0, 0)),   # grid-invariant weights
            pl.BlockSpec((Cout_p, K2), lambda n: (0, 0)),
            pl.BlockSpec((4, S), lambda n: (0, 0)),                # grid-invariant masks
        ],
        out_specs=pl.BlockSpec((Cout_p, BS), lambda n: (0, n)),
        compiler_params=pltpu.CompilerParams(
            dimension_semantics=("parallel",)),
    )(x, w1s, w2cat, masks)

    out = out.reshape(Cout_p, N_pad, S)[:Cout, :N]
    return jnp.transpose(out, (1, 0, 2)).reshape(N, Cout, H, W)


def _reference_forward(x_nchw, w1, w2, wexp, *, bf16_operands=False):
    """Pure-XLA reference (same math as the PyTorch forward with bn=False, last=True).

    bf16_operands=True mirrors the kernel's MXU operand rounding exactly (bf16 operands,
    f32 accumulation), allowing a tight comparison.
    """
    q = (lambda a: a.astype(jnp.bfloat16).astype(jnp.float32)) if bf16_operands else (lambda a: a)
    dn = ("NCHW", "HWIO", "NCHW")
    conv = functools.partial(lax.conv_general_dilated, dimension_numbers=dn,
                             precision=lax.Precision.HIGHEST)
    xq = q(x_nchw)
    ident = conv(xq, q(wexp).reshape(1, 1, *wexp.shape), (1, 1), "VALID")
    h = jnp.maximum(conv(xq, q(w1), (1, 1), "SAME"), 0.0)
    y = conv(q(h), q(w2), (1, 1), "SAME")
    return y + ident


if __name__ == "__main__":
    def run_case(N, Cin, H, W, Cout):
        Cmid = Cout if Cout > Cin else Cin            # mid_channels per __init__
        key = jax.random.PRNGKey(0)
        kx, k1, k2, ke = jax.random.split(key, 4)
        x = jax.random.normal(kx, (N, Cin, H, W), jnp.float32)
        # Deterministic kaiming-like init (no checkpoint loading).
        w1 = jax.random.normal(k1, (3, 3, Cin, Cmid), jnp.float32) * np.sqrt(2.0 / (9 * Cin))
        w2 = jax.random.normal(k2, (3, 3, Cmid, Cout), jnp.float32) * np.sqrt(2.0 / (9 * Cmid))
        wexp = jax.random.normal(ke, (Cin, Cout), jnp.float32) * np.sqrt(2.0 / Cin)

        out = jax.block_until_ready(bn_residual_block(x, w1, w2, wexp))
        assert out.shape == (N, Cout, H, W), out.shape

        # Tight check vs. a reference with identical bf16 operand rounding + f32 accumulation.
        ref_bf16 = _reference_forward(x, w1, w2, wexp, bf16_operands=True)
        np.testing.assert_allclose(np.asarray(out), np.asarray(ref_bf16), rtol=2e-2, atol=2e-2)
        # Loose sanity check vs. full-f32 math (bf16 MXU operand noise floor).
        ref_f32 = _reference_forward(x, w1, w2, wexp)
        np.testing.assert_allclose(np.asarray(out), np.asarray(ref_f32), rtol=1e-1, atol=1e-1)

    # Module-consistent small shapes (ResPool block with expand path: in=4 -> out=8).
    run_case(N=2, Cin=4, H=16, W=16, Cout=8)
    # Also exercise several images per grid step (cross-image masking on the lane axis).
    run_case(N=8, Cin=4, H=16, W=16, Cout=8)

    print("KERNEL_OK")
</pallas_src>

<mosaic_0001>
module attributes {stable_mosaic.version = 11 : i64} {
  func.func @_res_block_kernel(%arg0: i32, %arg1: memref<4x256xf32, #tpu.memory_space<vmem>>, %arg2: memref<8x72xbf16, #tpu.memory_space<vmem>>, %arg3: memref<8x80xbf16, #tpu.memory_space<vmem>>, %arg4: memref<4x256xbf16, #tpu.memory_space<vmem>>, %arg5: memref<8x256xf32, #tpu.memory_space<vmem>>) attributes {dimension_semantics = [#tpu.dimension_semantics<parallel>], iteration_bounds = array<i64: 2>, scalar_prefetch = 0 : i64, scratch_operands = 0 : i64, tpu.core_type = #tpu.core_type<tc>, window_params = [{transform_indices = @transform_0, window_bounds = array<i64: 4, 256>}, {pipeline_mode = #tpu.pipeline_mode<synchronous>, transform_indices = @transform_1, window_bounds = array<i64: 8, 72>}, {pipeline_mode = #tpu.pipeline_mode<synchronous>, transform_indices = @transform_2, window_bounds = array<i64: 8, 80>}, {pipeline_mode = #tpu.pipeline_mode<synchronous>, transform_indices = @transform_3, window_bounds = array<i64: 4, 256>}, {transform_indices = @transform_4, window_bounds = array<i64: 8, 256>}]} {
    %c0 = arith.constant 0 : index
    %c0_0 = arith.constant 0 : index
    %0 = vector.load %arg4[%c0, %c0_0] : memref<4x256xbf16, #tpu.memory_space<vmem>>, vector<4x256xbf16>
    %1 = vector.extract_strided_slice %0 {offsets = [0, 0], sizes = [1, 256], strides = [1, 1]} : vector<4x256xbf16> to vector<1x256xbf16>
    %2 = vector.extract_strided_slice %0 {offsets = [1, 0], sizes = [1, 256], strides = [1, 1]} : vector<4x256xbf16> to vector<1x256xbf16>
    %3 = vector.extract_strided_slice %0 {offsets = [2, 0], sizes = [1, 256], strides = [1, 1]} : vector<4x256xbf16> to vector<1x256xbf16>
    %4 = vector.extract_strided_slice %0 {offsets = [3, 0], sizes = [1, 256], strides = [1, 1]} : vector<4x256xbf16> to vector<1x256xbf16>
    %c0_1 = arith.constant 0 : index
    %c0_2 = arith.constant 0 : index
    %5 = vector.load %arg1[%c0_1, %c0_2] : memref<4x256xf32, #tpu.memory_space<vmem>>, vector<4x256xf32>
    %6 = arith.truncf %5 : vector<4x256xf32> to vector<4x256xbf16>
    %cst = arith.constant 0.000000e+00 : bf16
    %7 = vector.broadcast %cst : bf16 to vector<4x256xbf16>
    %8 = tpu.concatenate %6, %7 in 0 : vector<4x256xbf16>, vector<4x256xbf16> -> vector<8x256xbf16>
    %cst_3 = arith.constant 0.000000e+00 : bf16
    %9 = vector.broadcast %cst_3 : bf16 to vector<8x128xbf16>
    %10 = tpu.concatenate %9, %8, %9 in 1 : vector<8x128xbf16>, vector<8x256xbf16>, vector<8x128xbf16> -> vector<8x512xbf16>
    %11 = vector.extract_strided_slice %10 {offsets = [0, 111], sizes = [8, 256], strides = [1, 1]} : vector<8x512xbf16> to vector<8x256xbf16>
    %12 = vector.broadcast %3 : vector<1x256xbf16> to vector<8x256xbf16>
    %13 = arith.mulf %11, %12 : vector<8x256xbf16>
    %14 = vector.broadcast %1 : vector<1x256xbf16> to vector<8x256xbf16>
    %15 = arith.mulf %13, %14 : vector<8x256xbf16>
    %16 = vector.extract_strided_slice %10 {offsets = [0, 112], sizes = [8, 256], strides = [1, 1]} : vector<8x512xbf16> to vector<8x256xbf16>
    %17 = vector.broadcast %3 : vector<1x256xbf16> to vector<8x256xbf16>
    %18 = arith.mulf %16, %17 : vector<8x256xbf16>
    %19 = vector.extract_strided_slice %10 {offsets = [0, 113], sizes = [8, 256], strides = [1, 1]} : vector<8x512xbf16> to vector<8x256xbf16>
    %20 = vector.broadcast %3 : vector<1x256xbf16> to vector<8x256xbf16>
    %21 = arith.mulf %19, %20 : vector<8x256xbf16>
    %22 = vector.broadcast %2 : vector<1x256xbf16> to vector<8x256xbf16>
    %23 = arith.mulf %21, %22 : vector<8x256xbf16>
    %24 = vector.extract_strided_slice %10 {offsets = [0, 127], sizes = [8, 256], strides = [1, 1]} : vector<8x512xbf16> to vector<8x256xbf16>
    %25 = vector.broadcast %1 : vector<1x256xbf16> to vector<8x256xbf16>
    %26 = arith.mulf %24, %25 : vector<8x256xbf16>
    %27 = vector.extract_strided_slice %10 {offsets = [0, 128], sizes = [8, 256], strides = [1, 1]} : vector<8x512xbf16> to vector<8x256xbf16>
    %28 = vector.extract_strided_slice %10 {offsets = [0, 129], sizes = [8, 256], strides = [1, 1]} : vector<8x512xbf16> to vector<8x256xbf16>
    %29 = vector.broadcast %2 : vector<1x256xbf16> to vector<8x256xbf16>
    %30 = arith.mulf %28, %29 : vector<8x256xbf16>
    %31 = vector.extract_strided_slice %10 {offsets = [0, 143], sizes = [8, 256], strides = [1, 1]} : vector<8x512xbf16> to vector<8x256xbf16>
    %32 = vector.broadcast %4 : vector<1x256xbf16> to vector<8x256xbf16>
    %33 = arith.mulf %31, %32 : vector<8x256xbf16>
    %34 = vector.broadcast %1 : vector<1x256xbf16> to vector<8x256xbf16>
    %35 = arith.mulf %33, %34 : vector<8x256xbf16>
    %36 = vector.extract_strided_slice %10 {offsets = [0, 144], sizes = [8, 256], strides = [1, 1]} : vector<8x512xbf16> to vector<8x256xbf16>
    %37 = vector.broadcast %4 : vector<1x256xbf16> to vector<8x256xbf16>
    %38 = arith.mulf %36, %37 : vector<8x256xbf16>
    %39 = vector.extract_strided_slice %10 {offsets = [0, 145], sizes = [8, 256], strides = [1, 1]} : vector<8x512xbf16> to vector<8x256xbf16>
    %40 = vector.broadcast %4 : vector<1x256xbf16> to vector<8x256xbf16>
    %41 = arith.mulf %39, %40 : vector<8x256xbf16>
    %42 = vector.broadcast %2 : vector<1x256xbf16> to vector<8x256xbf16>
    %43 = arith.mulf %41, %42 : vector<8x256xbf16>
    %44 = tpu.concatenate %15, %18, %23, %26, %27, %30, %35, %38, %43 in 0 : vector<8x256xbf16>, vector<8x256xbf16>, vector<8x256xbf16>, vector<8x256xbf16>, vector<8x256xbf16>, vector<8x256xbf16>, vector<8x256xbf16>, vector<8x256xbf16>, vector<8x256xbf16> -> vector<72x256xbf16>
    %c0_4 = arith.constant 0 : index
    %c0_5 = arith.constant 0 : index
    %45 = vector.load %arg2[%c0_4, %c0_5] : memref<8x72xbf16, #tpu.memory_space<vmem>>, vector<8x72xbf16>
    %cst_6 = arith.constant dense<0.000000e+00> : vector<8x256xf32>
    %46 = tpu.matmul %45, %44, %cst_6 {dimension_numbers = #tpu.dot_dimension_numbers<[1], [0], [0], [1], [0, 0, 1, 1], [], []>} : vector<8x72xbf16>, vector<72x256xbf16>, vector<8x256xf32> -> vector<8x256xf32>
    %cst_7 = arith.constant 0.000000e+00 : f32
    %47 = vector.broadcast %cst_7 : f32 to vector<8x256xf32>
    %48 = arith.maximumf %46, %47 : vector<8x256xf32>
    %49 = arith.truncf %48 : vector<8x256xf32> to vector<8x256xbf16>
    %cst_8 = arith.constant 0.000000e+00 : bf16
    %50 = vector.broadcast %cst_8 : bf16 to vector<8x128xbf16>
    %51 = tpu.concatenate %50, %49, %50 in 1 : vector<8x128xbf16>, vector<8x256xbf16>, vector<8x128xbf16> -> vector<8x512xbf16>
    %52 = vector.extract_strided_slice %51 {offsets = [0, 111], sizes = [8, 256], strides = [1, 1]} : vector<8x512xbf16> to vector<8x256xbf16>
    %53 = vector.broadcast %3 : vector<1x256xbf16> to vector<8x256xbf16>
    %54 = arith.mulf %52, %53 : vector<8x256xbf16>
    %55 = vector.broadcast %1 : vector<1x256xbf16> to vector<8x256xbf16>
    %56 = arith.mulf %54, %55 : vector<8x256xbf16>
    %57 = vector.extract_strided_slice %51 {offsets = [0, 112], sizes = [8, 256], strides = [1, 1]} : vector<8x512xbf16> to vector<8x256xbf16>
    %58 = vector.broadcast %3 : vector<1x256xbf16> to vector<8x256xbf16>
    %59 = arith.mulf %57, %58 : vector<8x256xbf16>
    %60 = vector.extract_strided_slice %51 {offsets = [0, 113], sizes = [8, 256], strides = [1, 1]} : vector<8x512xbf16> to vector<8x256xbf16>
    %61 = vector.broadcast %3 : vector<1x256xbf16> to vector<8x256xbf16>
    %62 = arith.mulf %60, %61 : vector<8x256xbf16>
    %63 = vector.broadcast %2 : vector<1x256xbf16> to vector<8x256xbf16>
    %64 = arith.mulf %62, %63 : vector<8x256xbf16>
    %65 = vector.extract_strided_slice %51 {offsets = [0, 127], sizes = [8, 256], strides = [1, 1]} : vector<8x512xbf16> to vector<8x256xbf16>
    %66 = vector.broadcast %1 : vector<1x256xbf16> to vector<8x256xbf16>
    %67 = arith.mulf %65, %66 : vector<8x256xbf16>
    %68 = vector.extract_strided_slice %51 {offsets = [0, 128], sizes = [8, 256], strides = [1, 1]} : vector<8x512xbf16> to vector<8x256xbf16>
    %69 = vector.extract_strided_slice %51 {offsets = [0, 129], sizes = [8, 256], strides = [1, 1]} : vector<8x512xbf16> to vector<8x256xbf16>
    %70 = vector.broadcast %2 : vector<1x256xbf16> to vector<8x256xbf16>
    %71 = arith.mulf %69, %70 : vector<8x256xbf16>
    %72 = vector.extract_strided_slice %51 {offsets = [0, 143], sizes = [8, 256], strides = [1, 1]} : vector<8x512xbf16> to vector<8x256xbf16>
    %73 = vector.broadcast %4 : vector<1x256xbf16> to vector<8x256xbf16>
    %74 = arith.mulf %72, %73 : vector<8x256xbf16>
    %75 = vector.broadcast %1 : vector<1x256xbf16> to vector<8x256xbf16>
    %76 = arith.mulf %74, %75 : vector<8x256xbf16>
    %77 = vector.extract_strided_slice %51 {offsets = [0, 144], sizes = [8, 256], strides = [1, 1]} : vector<8x512xbf16> to vector<8x256xbf16>
    %78 = vector.broadcast %4 : vector<1x256xbf16> to vector<8x256xbf16>
    %79 = arith.mulf %77, %78 : vector<8x256xbf16>
    %80 = vector.extract_strided_slice %51 {offsets = [0, 145], sizes = [8, 256], strides = [1, 1]} : vector<8x512xbf16> to vector<8x256xbf16>
    %81 = vector.broadcast %4 : vector<1x256xbf16> to vector<8x256xbf16>
    %82 = arith.mulf %80, %81 : vector<8x256xbf16>
    %83 = vector.broadcast %2 : vector<1x256xbf16> to vector<8x256xbf16>
    %84 = arith.mulf %82, %83 : vector<8x256xbf16>
    %85 = tpu.concatenate %56, %59, %64, %67, %68, %71, %76, %79, %84, %8 in 0 : vector<8x256xbf16>, vector<8x256xbf16>, vector<8x256xbf16>, vector<8x256xbf16>, vector<8x256xbf16>, vector<8x256xbf16>, vector<8x256xbf16>, vector<8x256xbf16>, vector<8x256xbf16>, vector<8x256xbf16> -> vector<80x256xbf16>
    %c0_9 = arith.constant 0 : index
    %c0_10 = arith.constant 0 : index
    %86 = vector.load %arg3[%c0_9, %c0_10] : memref<8x80xbf16, #tpu.memory_space<vmem>>, vector<8x80xbf16>
    %cst_11 = arith.constant dense<0.000000e+00> : vector<8x256xf32>
    %87 = tpu.matmul %86, %85, %cst_11 {dimension_numbers = #tpu.dot_dimension_numbers<[1], [0], [0], [1], [0, 0, 1, 1], [], []>} : vector<8x80xbf16>, vector<80x256xbf16>, vector<8x256xf32> -> vector<8x256xf32>
    %c0_12 = arith.constant 0 : index
    %c0_13 = arith.constant 0 : index
    %88 = vector.load %arg5[%c0_12, %c0_13] : memref<8x256xf32, #tpu.memory_space<vmem>>, vector<8x256xf32>
    tpu.vector_store %arg5[%c0_12, %c0_13], %87 {strides = array<i32>} : memref<8x256xf32, #tpu.memory_space<vmem>>, vector<8x256xf32>,
    return
  }
  func.func @transform_0(%arg0: i32) -> (i32, i32) {
    %c0_i32 = arith.constant 0 : i32
    %c0_i32_0 = arith.constant 0 : i32
    return %c0_i32, %arg0 : i32, i32
  }
  func.func @transform_1(%arg0: i32) -> (i32, i32) {
    %c0_i32 = arith.constant 0 : i32
    %c0_i32_0 = arith.constant 0 : i32
    %c0_i32_1 = arith.constant 0 : i32
    return %c0_i32, %c0_i32_0 : i32, i32
  }
  func.func @transform_2(%arg0: i32) -> (i32, i32) {
    %c0_i32 = arith.constant 0 : i32
    %c0_i32_0 = arith.constant 0 : i32
    %c0_i32_1 = arith.constant 0 : i32
    return %c0_i32, %c0_i32_0 : i32, i32
  }
  func.func @transform_3(%arg0: i32) -> (i32, i32) {
    %c0_i32 = arith.constant 0 : i32
    %c0_i32_0 = arith.constant 0 : i32
    %c0_i32_1 = arith.constant 0 : i32
    return %c0_i32, %c0_i32_0 : i32, i32
  }
  func.func @transform_4(%arg0: i32) -> (i32, i32) {
    %c0_i32 = arith.constant 0 : i32
    %c0_i32_0 = arith.constant 0 : i32
    return %c0_i32, %arg0 : i32, i32
  }
}

</mosaic_0001>

<bundles_post_ra>
// kernel: bn_residual_block.1
= control target key start
LH: loop header
LB: loop body
LE: loop exit
PB: predicated region body
PF: predicated region fallthrough
CT: control target
= control target key end

     0   :  { %s1072_s15 = smov 0   ;;  %s1456_s0 = inlined_call_operand.vmem [shape: f32[4,512], index: 0, kind: input, shape index: {}]   ;;  %s1457_s1 = inlined_call_operand.vmem [shape: bf16[8,72], index: 1, kind: input, shape index: {}]   ;;  %s1458_s2 = inlined_call_operand.vmem [shape: bf16[8,80], index: 2, kind: input, shape index: {}]   ;;  %s1459_s3 = inlined_call_operand.vmem [shape: bf16[4,256], index: 3, kind: input, shape index: {}]   ;;  %s1460_s4 = inlined_call_operand.vmem [shape: f32[8,512], index: 4, kind: output, shape index: {}]  }
   0x1 LB: > { %s987_s16 = sadd.s32 4294967295, %s1031_s15   ;;  %p991_p0 = scmp.ge.s32.totalorder %s1031_s15, 1  ;;  %s1031_s15 = sphi %s1072_s15, %s14_s15  }
   0x2   : > { %p163_p1 = scmp.lt.s32.totalorder %s1031_s15, 3 }
   0x4   : > { %p164_p2 = pnand %p991_p0, %p163_p1 }
   0x5   : > { %v996_v0 = vld.sshfl [vmem:[%s1459_s3] sm:$0x33 pattern:$0x76325410] (!%p164_p2)  ;;  %v229_v1 = vlaneseq (!%p164_p2)  ;;  %s1033_s19 = smov (!%p164_p2), 113   ;;  %s1034_s20 = smov (!%p164_p2), 112  }
   0x6   : > { %167 = sbr.rel (%p164_p2) target bundleno = 1132 (0x46c), region = 36  ;;  %v225_v2 = vcombine.high (!%p164_p2), %v996_v0, %v996_v0  ;;  %v227_v3 = vpack.i.b16 (!%p164_p2), %v996_v0, %v996_v0  ;;  %v299_v8 = vshrl.u32 (!%p164_p2), %v996_v0, 16  ;;  %s1035_s21 = smov (!%p164_p2), 127   ;;  %vm209_vm0 = vcmask (!%p164_p2), 1041408  }
   0x7   : > { %v230_v4 = vshrl.u32 (!%p164_p2), %v229_v1, 7  ;;  %s1036_s22 = smov (!%p164_p2), 1   ;;  %s992_s23 = sshll.u32 (!%p164_p2), %s987_s16, 1  ;;  %vm291_vm1 = vcmask (!%p164_p2), 924672   ;;  %vm279_vm2 = vcmask (!%p164_p2), 916480   ;;  %vm330_vm3 = vcmask (!%p164_p2), 1039360  }
   0x8   : > { %v234_v6 = vpack.i.b16 (!%p164_p2), %v225_v2, %v225_v2  ;;  %v306_v11 = vshrl.u32 (!%p164_p2), %v225_v2, 16  ;;  %v300_v12 = vpack.i.b16 (!%p164_p2), %v299_v8, %v299_v8  ;;  %s1037_s24 = smov (!%p164_p2), 15   ;;  %p190_p3 = scmp.lt.s32.totalorder (!%p164_p2), %s992_s23, 3  ;;  %vm342_vm4 = vcmask (!%p164_p2), 7168  }
   0x9   : > { %v231_v5 = vsub.s32 (!%p164_p2), 1, %v230_v4  ;;  %v256_v10 = vsub.s32 (!%p164_p2), 0, %v230_v4  ;;  %s1038_s25 = smov (!%p164_p2), 16   ;;  %s1039_s30 = smov (!%p164_p2), 17   ;;  %vm364_vm5 = vcmask (!%p164_p2), 121856   ;;  %vm387_vm6 = vcmask (!%p164_p2), 130048  }
   0xa   : > { %v307_v15 = vpack.i.b16 (!%p164_p2), %v306_v11, %v306_v11  ;;  %s1040_s5 = smov (!%p164_p2), 111   ;;  %s1041_s6 = smov (!%p164_p2), 126   ;;  %vm399_vm7 = vcmask (!%p164_p2), 138240   ;;  %vm519_vm8 = vcmask (!%p164_p2), 1043456   ;;  %vm246_vm9 = vcmask (!%p164_p2), 908288  }
   0xb   : > { %v232_v7 = vrot.slane (!%p164_p2), %v227_v3, %v231_v5  ;;  %v239_v9 = vrot.slane (!%p164_p2), %v234_v6, %v231_v5  ;;  %v261_v13 = vrot.slane (!%p164_p2), %v234_v6, %v256_v10  ;;  %v257_v14 = vrot.slane (!%p164_p2), %v227_v3, %v256_v10  ;;  %s1042_s7 = smov (!%p164_p2), 110   ;;  %s1043_s8 = smov (!%p164_p2), 95  }
   0xc   : > { %v312_v16 = vrot.slane (!%p164_p2), %v307_v15, %v256_v10  ;;  %v305_v17 = vrot.slane (!%p164_p2), %v300_v12, %v256_v10  ;;  %v357_v18 = vrot.slane (!%p164_p2), %v307_v15, %v231_v5  ;;  %v353_v19 = vrot.slane (!%p164_p2), %v300_v12, %v231_v5  ;;  %s1044_s9 = smov (!%p164_p2), 96   ;;  %s1045_s10 = smov (!%p164_p2), 94  }
   0xd   : > { %287 = vrot.lane.b32.xlu1 %v232_v7, %s1033_s19  ;;  %275 = vrot.lane.b32.xlu0 %v232_v7, %s1034_s20  ;;  %s1462_s23 = smov (!%p190_p3, %s992_s23), 3  ;;  %vm441_vm10 = vcmask 1031168   ;;  %vm477_vm11 = vcmask 900096   ;;  %vm504_vm12 = vcmask 777216   ;;  %vm489_vm13 = vcmask 785408  }
   0xe   : > { %s993_s26 = sshll.u32 %s1462_s23, 2  ;;  %vm516_vm14 = vcmask 769024   ;;  %vm617_vm15 = vcmask 588800   ;;  %s995_s16 = sshll.u32 %s1462_s23, 3 }
   0xf   : > { %s193_s29 = scalar_lea.vmem %s1456_s0, %s993_s26 }
  0x10   : > { %v203_v20 = vld [vmem:[%s193_s29] sm:$0xff] }
  0x11   : > { %289 = vrot.lane.b32.xlu1 %v239_v9, %s1033_s19  ;;  %277 = vrot.lane.b32.xlu0 %v239_v9, %s1034_s20  ;;  %v205_v21 = vcombine.high %v203_v20, %v203_v20  ;;  %v207_v23 = vpack.c.bf16 %v203_v20, %v203_v20 }
  0x13   : > { %v208_v22 = vpack.c.bf16 %v205_v21, %v205_v21  ;;  %v1105_v25 = vsel %vm209_vm0, %v207_v23, 0 }
  0x15   : > { %328 = vrot.lane.b32.xlu1 %v261_v13, %s1035_s21  ;;  %326 = vrot.lane.b32.xlu0 %v257_v14, %s1035_s21  ;;  %v1103_v24 = vsel %vm209_vm0, %v208_v22, 0  ;;  %vm884_vm0 = vcmask 654336  }
  0x19   : > { %317 = vrot.lane.b32.xlu1 %v312_v16, %s1033_s19  ;;  %315 = vrot.lane.b32.xlu0 %v305_v17, %s1033_s19  ;;  %s199_s19 = scalar_lea.vmem %s1460_s4, %s995_s16 }
  0x1d   : > { %340 = vrot.lane.b32.xlu1 %v312_v16, %s1036_s22  ;;  %338 = vrot.lane.b32.xlu0 %v305_v17, %s1036_s22 }
  0x21   : > { %362 = vrot.lane.b32.xlu1 %v357_v18, %s1037_s24  ;;  %360 = vrot.lane.b32.xlu0 %v353_v19, %s1037_s24 }
  0x25   : > { %385 = vrot.lane.b32.xlu1 %v357_v18, %s1038_s25  ;;  %383 = vrot.lane.b32.xlu0 %v353_v19, %s1038_s25 }
  0x29   : > { %374 = vrot.lane.b32.xlu1 %v261_v13, %s1037_s24  ;;  %372 = vrot.lane.b32.xlu0 %v257_v14, %s1037_s24 }
  0x2d   : > { %397 = vrot.lane.b32.xlu1 %v357_v18, %s1039_s30  ;;  %395 = vrot.lane.b32.xlu0 %v353_v19, %s1039_s30 }
  0x31   : > { %409 = vrot.lane.b32.xlu1 %v312_v16, %s1039_s30  ;;  %407 = vrot.lane.b32.xlu0 %v305_v17, %s1039_s30 }
  0x35   : > { %242 = vrot.lane.b32.xlu0 %v232_v7, %s1040_s5  ;;  %244 = vrot.lane.b32.xlu1 %v239_v9, %s1040_s5 }
  0x39   : > { %264 = vrot.lane.b32.xlu0 %v257_v14, %s1040_s5  ;;  %266 = vrot.lane.b32.xlu1 %v261_v13, %s1040_s5 }
  0x3d   : > { %462 = vrot.lane.b32.xlu0 %v1103_v24, %s1040_s5  ;;  %460 = vrot.lane.b32.xlu1 %v1105_v25, %s1040_s5 }
  0x7f   : > { %v288_v26 = vpop.permute.xlu1 %287  ;;  %v276_v27 = vpop.permute.xlu0 %275 }
  0x80   : > { %v284_v28 = vmul.bf16 0, %v276_v27  ;;  %v296_v36 = vmul.bf16 0, %v288_v26 }
  0x82   : > { %v421_v29 = vrot.slane %v284_v28, 4 }
  0x83   : > { %v1111_v30 = vpop.permute.xlu1 %289  ;;  %v1113_v31 = vpop.permute.xlu0 %277 }
  0x84   : > { %v286_v32 = vmul.bf16 %v1113_v31, %v1103_v24  ;;  %424 = vrot.lane.b32.xlu0 %v421_v29, %s1035_s21  ;;  %v298_v37 = vmul.bf16 %v1111_v30, %v1103_v24  ;;  %v1144_v54 = vsel %vm291_vm1, %v288_v26, %v1111_v30  ;;  %v1148_v55 = vsel %vm279_vm2, %v276_v27, %v1113_v31 }
  0x85   : > { %v297_v61 = vmul.bf16 %v1144_v54, %v1105_v25  ;;  %v285_v0 = vmul.bf16 %v1148_v55, %v1105_v25 }
  0x86   : > { %v423_v33 = vrot.slane %v286_v32, 4 }
  0x87   : > { %v1118_v34 = vpop.permute.xlu1 %328  ;;  %v327_v35 = vpop.permute.xlu0 %326  ;;  %v422_v4 = vrot.slane %v285_v0, 4 }
  0x88   : > { %428 = vrot.lane.b32.xlu1 %v423_v33, %s1035_s21  ;;  %v337_v40 = vmul.bf16 %v1118_v34, %v1103_v24  ;;  %v335_v44 = vmul.bf16 0, %v327_v35  ;;  %v1154_v58 = vsel %vm330_vm3, %v327_v35, %v1118_v34 }
  0x89   : > { %v336_v1 = vmul.bf16 %v1154_v58, %v1105_v25 }
  0x8a   : > { %v449_v47 = vrot.slane %v337_v40, 4  ;;  %v447_v50 = vrot.slane %v335_v44, 4 }
  0x8b   : > { %v1123_v38 = vpop.permute.xlu1 %317  ;;  %v316_v39 = vpop.permute.xlu0 %315  ;;  %v448_v6 = vrot.slane %v336_v1, 4 }
  0x8c   : > { %v325_v41 = vmul.bf16 %v1123_v38, %v298_v37  ;;  %v323_v42 = vmul.bf16 %v316_v39, %v296_v36  ;;  %v1157_v59 = vsel %vm291_vm1, %v316_v39, %v1123_v38 }
  0x8d   : > { %v324_v2 = vmul.bf16 %v1157_v59, %v297_v61 }
  0x8e   : > { %439 = vrot.lane.b32.xlu0 %v325_v41, %s1041_s6  ;;  %435 = vrot.lane.b32.xlu1 %v323_v42, %s1041_s6 }
  0x8f   : > { %v1130_v43 = vpop.permute.xlu0 %338  ;;  %v341_v45 = vpop.permute.xlu1 %340 }
  0x90   : > { %v347_v46 = vmul.bf16 %v1130_v43, %v1105_v25  ;;  %v1173_v5 = vsel %vm342_vm4, %v1130_v43, %v341_v45  ;;  %v349_v7 = vmul.bf16 0, %v341_v45 }
  0x91   : > { %v348_v10 = vmul.bf16 %v1173_v5, %v1103_v24 }
  0x92   : > { %454 = vrot.lane.b32.xlu0 %v449_v47, %s1034_s20  ;;  %v468_v48 = vrot.slane %v347_v46, 4  ;;  %v470_v13 = vrot.slane %v349_v7, 4 }
  0x93   : > { %v1135_v49 = vpop.permute.xlu0 %360  ;;  %v363_v51 = vpop.permute.xlu1 %362  ;;  %v469_v18 = vrot.slane %v348_v10, 4 }
  0x94   : > { %471 = vrot.lane.b32.xlu1 %v468_v48, %s1042_s7  ;;  %v369_v56 = vmul.bf16 %v1135_v49, %v1105_v25  ;;  %v371_v3 = vmul.bf16 0, %v363_v51  ;;  %v1180_v11 = vsel %vm364_vm5, %v1135_v49, %v363_v51 }
  0x95   : > { %v370_v17 = vmul.bf16 %v1180_v11, %v1103_v24 }
  0x96   : > { %450 = vrot.lane.b32.xlu0 %v447_v50, %s1034_s20 }
  0x97   : > { %v1139_v52 = vpop.permute.xlu0 %383  ;;  %v386_v62 = vpop.permute.xlu1 %385 }
  0x98   : > { %v392_v53 = vmul.bf16 %v1139_v52, %v1105_v25  ;;  %v1183_v12 = vsel %vm387_vm6, %v1139_v52, %v386_v62  ;;  %v394_v20 = vmul.bf16 0, %v386_v62 }
  0x99   : > { %v393_v19 = vmul.bf16 %v1183_v12, %v1103_v24 }
  0x9a   : > { %v495_v57 = vrot.slane %v392_v53, 4  ;;  %v497_v29 = vrot.slane %v394_v20, 4 }
  0x9b   : > { %v1159_v60 = vpop.permute.xlu0 %372  ;;  %v375_v8 = vpop.permute.xlu1 %374  ;;  %v496_v28 = vrot.slane %v393_v19, 4 }
  0x9c   : > { %v380_v63 = vmul.bf16 %v1159_v60, %v369_v56  ;;  %498 = vrot.lane.b32.xlu1 %v495_v57, %s1043_s8  ;;  %v382_v9 = vmul.bf16 %v375_v8, %v371_v3  ;;  %v1189_v16 = vsel %vm364_vm5, %v1159_v60, %v375_v8 }
  0x9d   : > { %v381_v21 = vmul.bf16 %v1189_v16, %v370_v17 }
  0x9e   : > { %483 = vrot.lane.b32.xlu0 %v380_v63, %s1044_s9 }
  0x9f   : > { %v398_v14 = vpop.permute.xlu1 %397  ;;  %v1186_v15 = vpop.permute.xlu0 %395 }
  0xa0   : > { %437 = vrot.lane.b32.xlu1 %v324_v2, %s1041_s6  ;;  %v1200_v22 = vsel %vm399_vm7, %v1186_v15, %v398_v14  ;;  %v404_v23 = vmul.bf16 %v1186_v15, %v1105_v25  ;;  %v406_v32 = vmul.bf16 0, %v398_v14 }
  0xa1   : > { %v405_v33 = vmul.bf16 %v1200_v22, %v1103_v24 }
  0xa2   : > { %426 = vrot.lane.b32.xlu0 %v422_v4, %s1035_s21 }
  0xa3   : > { %v410_v26 = vpop.permute.xlu1 %409  ;;  %v1205_v27 = vpop.permute.xlu0 %407 }
  0xa4   : > { %452 = vrot.lane.b32.xlu1 %v448_v6, %s1034_s20  ;;  %v1212_v35 = vsel %vm399_vm7, %v1205_v27, %v410_v26  ;;  %v415_v36 = vmul.bf16 %v1205_v27, %v404_v23  ;;  %v417_v37 = vmul.bf16 %v410_v26, %v406_v32 }
  0xa5   : > { %v416_v39 = vmul.bf16 %v1212_v35, %v405_v33 }
  0xa6   : > { %487 = vrot.lane.b32.xlu0 %v382_v9, %s1044_s9 }
  0xa7   : > { %v1220_v40 = vpop.permute.xlu1 %244  ;;  %v243_v41 = vpop.permute.xlu0 %242 }
  0xa8   : > { %475 = vrot.lane.b32.xlu1 %v470_v13, %s1042_s7  ;;  %v253_v45 = vmul.bf16 %v1220_v40, %v1103_v24  ;;  %v1246_v2 = vsel %vm246_vm9, %v243_v41, %v1220_v40  ;;  %v251_v10 = vmul.bf16 0, %v243_v41 }
  0xa9   : > { %v252_v4 = vmul.bf16 %v1246_v2, %v1105_v25 }
  0xaa   : > { %473 = vrot.lane.b32.xlu0 %v469_v18, %s1042_s7 }
  0xab   : > { %v1222_v42 = vpop.permute.xlu1 %266  ;;  %v265_v44 = vpop.permute.xlu0 %264 }
  0xac   : > { %485 = vrot.lane.b32.xlu1 %v381_v21, %s1044_s9  ;;  %v274_v48 = vmul.bf16 %v1222_v42, %v253_v45  ;;  %v1252_v7 = vsel %vm246_vm9, %v265_v44, %v1222_v42  ;;  %v1264_v26 = vmul.bf16 %v265_v44, %v251_v10  ;;  %v1046_v10 = vmov 0  }
  0xad   : > { %v273_v13 = vmul.bf16 %v1252_v7, %v252_v4  ;;  %659 = vmatprep.mubr.bf16.mxu0 %v1046_v10  ;;  %920 = vmatprep.mubr.bf16.mxu1 %v1046_v10 }
  0xae   : > { %500 = vrot.lane.b32.xlu0 %v496_v28, %s1043_s8 }
  0xaf   : > { %v1226_v46 = vpop.permute.xlu1 %460  ;;  %v1228_v47 = vpop.permute.xlu0 %462 }
  0xb0   : > { %502 = vrot.lane.b32.xlu1 %v497_v29, %s1043_s8 }
  0xb2   : > { %510 = vrot.lane.b32.xlu0 %v415_v36, %s1045_s10 }
  0xb4   : > { %512 = vrot.lane.b32.xlu1 %v416_v39, %s1045_s10 }
  0xb6   : > { %514 = vrot.lane.b32.xlu0 %v417_v37, %s1045_s10 }
  0xf6   : > { %v1232_v53 = vpop.permute.xlu0 %424 }
  0xfa   : > { %v429_v50 = vpop.permute.xlu1 %428 }
  0xfb   : > { %v528_v51 = vsel %vm519_vm8, %v274_v48, %v429_v50 }
  0xfc   : > { %573 = vrot.lane.b32.xlu0 %v528_v51, %s1039_s30 }
 0x100   : > { %v440_v56 = vpop.permute.xlu0 %439  ;;  %v1235_v57 = vpop.permute.xlu1 %435 }
 0x104   : > { %v455_v61 = vpop.permute.xlu0 %454 }
 0x105   : > { %v537_v62 = vsel %vm519_vm8, %v440_v56, %v455_v61 }
 0x106   : > { %579 = vrot.lane.b32.xlu1 %v537_v62, %s1039_s30  ;;  %v472_v63 = vpop.permute.xlu1 %471 }
 0x107   : > { %v540_v0 = vsel %vm519_vm8, %v1226_v46, %v472_v63 }
 0x108   : > { %v1242_v1 = vpop.permute.xlu0 %450 }
 0x10a   : > { %581 = vrot.lane.b32.xlu1 %v540_v0, %s1039_s30 }
 0x10e   : > { %v499_v3 = vpop.permute.xlu1 %498 }
 0x110   : > { %v484_v6 = vpop.permute.xlu0 %483 }
 0x111   : > { %v549_v8 = vsel %vm519_vm8, %v484_v6, %v499_v3 }
 0x112   : > { %v438_v9 = vpop.permute.xlu1 %437  ;;  %587 = vrot.lane.b32.xlu0 %v549_v8, %s1039_s30 }
 0x113   : > { %v443_v20 = vsel %vm441_vm10, %v438_v9, %v440_v56  ;;  %v442_v37 = vsel %vm441_vm10, %v1235_v57, %v438_v9 }
 0x114   : > { %v427_v14 = vpop.permute.xlu0 %426 }
 0x115   : > { %v431_v17 = vsel %vm330_vm3, %v427_v14, %v429_v50  ;;  %v430_v21 = vsel %vm330_vm3, %v1232_v53, %v427_v14 }
 0x116   : > { %v453_v18 = vpop.permute.xlu1 %452  ;;  %v525_v19 = vsel %vm519_vm8, %v273_v13, %v431_v17  ;;  %v522_v36 = vsel %vm519_vm8, %v1264_v26, %v430_v21 }
 0x117   : > { %v457_v23 = vsel %vm279_vm2, %v453_v18, %v455_v61  ;;  %571 = vrot.lane.b32.xlu1 %v525_v19, %s1039_s30  ;;  %v456_v32 = vsel %vm279_vm2, %v1242_v1, %v453_v18 }
 0x118   : > { %v1266_v28 = vpop.permute.xlu0 %487  ;;  %v534_v29 = vsel %vm519_vm8, %v443_v20, %v457_v23  ;;  %v531_v41 = vsel %vm519_vm8, %v442_v37, %v456_v32 }
 0x119   : > { %577 = vrot.lane.b32.xlu0 %v534_v29, %s1039_s30 }
 0x11a   : > { %v1272_v33 = vpop.permute.xlu1 %475 }
 0x11b   : > { %569 = vrot.lane.b32.xlu1 %v522_v36, %s1039_s30 }
 0x11c   : > { %v474_v39 = vpop.permute.xlu0 %473 }
 0x11d   : > { %v479_v44 = vsel %vm477_vm11, %v474_v39, %v1272_v33  ;;  %575 = vrot.lane.b32.xlu0 %v531_v41, %s1039_s30  ;;  %v478_v4 = vsel %vm477_vm11, %v472_v63, %v474_v39 }
 0x11e   : > { %v486_v45 = vpop.permute.xlu1 %485  ;;  %v546_v50 = vsel %vm519_vm8, %v1228_v47, %v479_v44 }
 0x11f   : > { %v490_v61 = vsel %vm489_vm13, %v484_v6, %v486_v45  ;;  %v491_v63 = vsel %vm489_vm13, %v486_v45, %v1266_v28 }
 0x120   : > { %v501_v48 = vpop.permute.xlu0 %500 }
 0x121   : > { %v505_v51 = vsel %vm504_vm12, %v499_v3, %v501_v48  ;;  %585 = vrot.lane.b32.xlu0 %v546_v50, %s1039_s30  ;;  %v464_v3 = vsel %vm246_vm9, %v1226_v46, %v1228_v47 }
 0x122   : > { %v1287_v56 = vpop.permute.xlu1 %502  ;;  %v552_v0 = vsel %vm519_vm8, %v490_v61, %v505_v51  ;;  %v543_v6 = vsel %vm519_vm8, %v464_v3, %v478_v4 }
 0x123   : > { %v506_v13 = vsel %vm504_vm12, %v501_v48, %v1287_v56 }
 0x124   : > { %v511_v62 = vpop.permute.xlu0 %510  ;;  %v555_v14 = vsel %vm519_vm8, %v491_v63, %v506_v13  ;;  %v556_v13 = vld [vmem:[%s1457_s1] sm:$0xf] }
 0x125   : > { %593 = vrot.lane.b32.xlu1 %v511_v62, %s1039_s30  ;;  %589 = vrot.lane.b32.xlu0 %v552_v0, %s1039_s30 }
 0x126   : > { %v513_v8 = vpop.permute.xlu1 %512 }
 0x127   : > { %v517_v9 = vsel %vm516_vm14, %v511_v62, %v513_v8 }
 0x128   : > { %v1306_v46 = vpop.permute.xlu0 %514 }
 0x129   : > { %583 = vrot.lane.b32.xlu1 %v543_v6, %s1039_s30  ;;  %595 = vrot.lane.b32.xlu0 %v517_v9, %s1039_s30  ;;  %v518_v47 = vsel %vm516_vm14, %v513_v8, %v1306_v46 }
 0x12d   : > { %591 = vrot.lane.b32.xlu1 %v555_v14, %s1039_s30 }
 0x131   : > { %597 = vrot.lane.b32.xlu1 %v518_v47, %s1039_s30 }
 0x16e   : > { %v574_v18 = vpop.permute.xlu0 %573 }
 0x178   : > { %v580_v17 = vpop.permute.xlu1 %579 }
 0x17c   : > { %v582_v19 = vpop.permute.xlu1 %581 }
 0x184   : > { %v588_v20 = vpop.permute.xlu0 %587 }
 0x189   : > { %v572_v21 = vpop.permute.xlu1 %571 }
 0x18a   : > { %v600_v23 = vsel %vm399_vm7, %v572_v21, %v574_v18 }
 0x18b   : > { %627 = vmatprep.subr.bf16.mxu0 %v600_v23  ;;  %v578_v29 = vpop.permute.xlu0 %577 }
 0x18c   : > { %v602_v39 = vsel %vm399_vm7, %v578_v29, %v580_v17 }
 0x18d   : > { %v570_v32 = vpop.permute.xlu1 %569 }
 0x18e   : > { %v599_v36 = vsel %vm399_vm7, %v570_v32, %v572_v21 }
 0x18f   : > { %628 = vmatpush1.bf16.msra.mxu0 %v599_v36  ;;  %v576_v37 = vpop.permute.xlu0 %575 }
 0x190   : > { %629 = vmatprep.subr.bf16.mxu0 %v602_v39  ;;  %v601_v41 = vsel %vm399_vm7, %v576_v37, %v578_v29 }
 0x193   : > { %630 = vmatpush1.bf16.msra.mxu0 %v601_v41  ;;  %v586_v44 = vpop.permute.xlu0 %585 }
 0x197   : > { %v594_v45 = vpop.permute.xlu1 %593  ;;  %v590_v48 = vpop.permute.xlu0 %589 }
 0x198   : > { %v605_v8 = vsel %vm399_vm7, %v588_v20, %v590_v48 }
 0x19b   : > { %v584_v50 = vpop.permute.xlu1 %583  ;;  %v596_v62 = vpop.permute.xlu0 %595 }
 0x19c   : > { %v604_v51 = vsel %vm399_vm7, %v584_v50, %v586_v44  ;;  %v603_v61 = vsel %vm399_vm7, %v582_v19, %v584_v50  ;;  %v607_v3 = vsel %vm399_vm7, %v594_v45, %v596_v62 }
 0x19d   : > { %631 = vmatprep.subr.bf16.mxu0 %v604_v51  ;;  %v622_v6 = vsel %vm519_vm8, %v607_v3, 0 }
 0x19e   : > { %632 = vmatpush1.bf16.msra.mxu0 %v603_v61 }
 0x19f   : > { %v592_v0 = vpop.permute.xlu1 %591 }
 0x1a0   : > { %v606_v4 = vsel %vm399_vm7, %v590_v48, %v592_v0 }
 0x1a1   : > { %633 = vmatprep.subr.bf16.mxu0 %v606_v4 }
 0x1a2   : > { %634 = vmatpush1.bf16.msra.mxu0 %v605_v8 }
 0x1a3   : > { %v598_v9 = vpop.permute.xlu1 %597 }
 0x1a4   : > { %v608_v10 = vsel %vm399_vm7, %v596_v62, %v598_v9 }
 0x1a5   : > { %997 = vmatprep.subr.msk.bf16.mxu0 %vm519_vm8, %v608_v10 }
 0x1a6   : > { %636 = vmatpush1.bf16.msra.mxu0 %v622_v6 }
 0x1a9   : > { %998 = vmatmul.mubr.msk.bf16.vlgmr.msra.gmra.mrb[0].mxu0 %vm617_vm15, %v556_v13 }
 0x27c   : > { %v661_v63 = vpop.f32.mrb[0].mxu0 }
 0x27d   : > { %v668_v14 = vmax.f32 %v661_v63, 0.0  ;;  %v663_v47 = vpop.f32.mrb[1].mxu0 }
 0x27e   : > { %v669_v17 = vmax.f32 %v663_v47, 0.0  ;;  %v665_v18 = vpop.f32.mrb[2].mxu0 }
 0x27f   : > { %v1327_v19 = vpack.c.bf16 %v668_v14, %v668_v14  ;;  %v666_v20 = vpop.f32.mrb[3].mxu0 }
 0x280   : > { %v671_v21 = vpack.c.bf16 %v669_v17, %v669_v17 }
 0x281   : > { %726 = vrot.lane.b32.xlu0 %v1327_v19, %s1040_s5  ;;  %v676_v23 = vmul.bf16 %v1327_v19, %v1148_v55  ;;  %v678_v36 = vmul.bf16 %v1327_v19, %v1144_v54  ;;  %v682_v55 = vmul.bf16 %v1327_v19, %v1154_v58  ;;  %v672_v10 = vmul.bf16 %v1327_v19, %v1246_v2 }
 0x282   : > { %728 = vrot.lane.b32.xlu1 %v671_v21, %s1040_s5  ;;  %v677_v29 = vmul.bf16 %v671_v21, %v1113_v31  ;;  %v679_v39 = vmul.bf16 %v671_v21, %v1111_v30  ;;  %v683_v31 = vmul.bf16 %v671_v21, %v1118_v34  ;;  %v684_v30 = vmul.bf16 %v1327_v19, %v1130_v43 }
 0x283   : > { %v698_v32 = vrot.slane %v676_v23, 4  ;;  %v680_v41 = vmul.bf16 %v678_v36, %v1157_v59  ;;  %v716_v54 = vrot.slane %v682_v55, 4  ;;  %v685_v48 = vmul.bf16 %v671_v21, %v1173_v5 }
 0x284   : > { %v699_v37 = vrot.slane %v677_v29, 4  ;;  %v681_v44 = vmul.bf16 %v679_v39, %v1123_v38  ;;  %v717_v45 = vrot.slane %v683_v31, 4  ;;  %v733_v58 = vrot.slane %v684_v30, 4 }
 0x285   : > { %700 = vrot.lane.b32.xlu0 %v698_v32, %s1035_s21  ;;  %v686_v38 = vmul.bf16 %v1327_v19, %v1135_v49  ;;  %v734_v34 = vrot.slane %v685_v48, 4  ;;  %v687_v59 = vmul.bf16 %v671_v21, %v1180_v11  ;;  %v690_v5 = vmul.bf16 %v1327_v19, %v1139_v52 }
 0x286   : > { %702 = vrot.lane.b32.xlu1 %v699_v37, %s1035_s21  ;;  %v691_v51 = vmul.bf16 %v671_v21, %v1183_v12  ;;  %v692_v11 = vmul.bf16 %v1327_v19, %v1186_v15  ;;  %v693_v62 = vmul.bf16 %v671_v21, %v1200_v22  ;;  %v767_v12 = vrot.slane %v1105_v25, 4 }
 0x287   : > { %v688_v43 = vmul.bf16 %v686_v38, %v1159_v60  ;;  %v689_v50 = vmul.bf16 %v687_v59, %v1189_v16  ;;  %v751_v49 = vrot.slane %v690_v5, 4  ;;  %v768_v16 = vrot.slane %v1103_v24, 4 }
 0x288   : > { %v752_v61 = vrot.slane %v691_v51, 4  ;;  %v694_v52 = vmul.bf16 %v692_v11, %v1205_v27  ;;  %v695_v60 = vmul.bf16 %v693_v62, %v1212_v35  ;;  %v673_v22 = vmul.bf16 %v671_v21, %v1220_v40 }
 0x289   : > { %708 = vrot.lane.b32.xlu0 %v680_v41, %s1041_s6  ;;  %v674_v2 = vmul.bf16 %v672_v10, %v1252_v7 }
 0x28a   : > { %710 = vrot.lane.b32.xlu1 %v681_v44, %s1041_s6  ;;  %v675_v27 = vmul.bf16 %v673_v22, %v1222_v42 }
 0x28d   : > { %718 = vrot.lane.b32.xlu0 %v716_v54, %s1034_s20 }
 0x28e   : > { %720 = vrot.lane.b32.xlu1 %v717_v45, %s1034_s20 }
 0x291   : > { %735 = vrot.lane.b32.xlu0 %v733_v58, %s1042_s7 }
 0x292   : > { %737 = vrot.lane.b32.xlu1 %v734_v34, %s1042_s7 }
 0x295   : > { %743 = vrot.lane.b32.xlu0 %v688_v43, %s1044_s9 }
 0x296   : > { %745 = vrot.lane.b32.xlu1 %v689_v50, %s1044_s9 }
 0x299   : > { %753 = vrot.lane.b32.xlu0 %v751_v49, %s1043_s8 }
 0x29a   : > { %755 = vrot.lane.b32.xlu1 %v752_v61, %s1043_s8 }
 0x29d   : > { %761 = vrot.lane.b32.xlu0 %v694_v52, %s1045_s10 }
 0x29e   : > { %763 = vrot.lane.b32.xlu1 %v695_v60, %s1045_s10 }
 0x2a1   : > { %769 = vrot.lane.b32.xlu0 %v767_v12, %s1040_s5 }
 0x2a2   : > { %771 = vrot.lane.b32.xlu1 %v768_v16, %s1040_s5 }
 0x2f3   : > { %v727_v15 = vpop.permute.xlu0 %726 }
 0x2f4   : > { %v729_v0 = vpop.permute.xlu1 %728 }
 0x2f5   : > { %v730_v21 = vsel %vm246_vm9, %v727_v15, %v729_v0 }
 0x2f7   : > { %v701_v4 = vpop.permute.xlu0 %700 }
 0x2f8   : > { %v704_v35 = vsel %vm330_vm3, %v1232_v53, %v701_v4  ;;  %v703_v8 = vpop.permute.xlu1 %702 }
 0x2f9   : > { %v775_v25 = vsel %vm519_vm8, %v1264_v26, %v704_v35  ;;  %v781_v24 = vsel %vm519_vm8, %v675_v27, %v703_v8  ;;  %v705_v63 = vsel %vm330_vm3, %v701_v4, %v703_v8 }
 0x2fa   : > { %834 = vrot.lane.b32.xlu0 %v775_v25, %s1039_s30  ;;  %838 = vrot.lane.b32.xlu1 %v781_v24, %s1039_s30 }
 0x2fb   : > { %v709_v3 = vpop.permute.xlu0 %708 }
 0x2fc   : > { %v711_v9 = vpop.permute.xlu1 %710  ;;  %v712_v42 = vsel %vm441_vm10, %v1235_v57, %v709_v3  ;;  %v778_v57 = vsel %vm519_vm8, %v674_v2, %v705_v63 }
 0x2fd   : > { %v713_v37 = vsel %vm441_vm10, %v709_v3, %v711_v9 }
 0x2ff   : > { %v719_v40 = vpop.permute.xlu0 %718 }
 0x300   : > { %v722_v53 = vsel %vm279_vm2, %v1242_v1, %v719_v40  ;;  %v721_v6 = vpop.permute.xlu1 %720 }
 0x301   : > { %v790_v26 = vsel %vm519_vm8, %v711_v9, %v721_v6  ;;  %v784_v13 = vsel %vm519_vm8, %v712_v42, %v722_v53  ;;  %v723_v7 = vsel %vm279_vm2, %v719_v40, %v721_v6  ;;  %v818_v53 = vld [vmem:[%s1458_s2] sm:$0xf] }
 0x302   : > { %844 = vrot.lane.b32.xlu0 %v790_v26, %s1039_s30  ;;  %840 = vrot.lane.b32.xlu1 %v784_v13, %s1039_s30  ;;  %v787_v44 = vsel %vm519_vm8, %v713_v37, %v723_v7 }
 0x303   : > { %v736_v14 = vpop.permute.xlu0 %735 }
 0x304   : > { %v738_v47 = vpop.permute.xlu1 %737  ;;  %v793_v18 = vsel %vm519_vm8, %v727_v15, %v736_v14 }
 0x305   : > { %v739_v19 = vsel %vm477_vm11, %v736_v14, %v738_v47  ;;  %v740_v31 = vsel %vm477_vm11, %v738_v47, %v1272_v33 }
 0x306   : > { %836 = vrot.lane.b32.xlu0 %v778_v57, %s1039_s30  ;;  %v796_v32 = vsel %vm519_vm8, %v730_v21, %v739_v19  ;;  %v799_v45 = vsel %vm519_vm8, %v729_v0, %v740_v31 }
 0x307   : > { %v744_v1 = vpop.permute.xlu0 %743 }
 0x308   : > { %v746_v17 = vpop.permute.xlu1 %745 }
 0x309   : > { %v748_v41 = vsel %vm489_vm13, %v746_v17, %v1266_v28  ;;  %v747_v38 = vsel %vm489_vm13, %v744_v1, %v746_v17 }
 0x30a   : > { %846 = vrot.lane.b32.xlu0 %v793_v18, %s1039_s30 }
 0x30b   : > { %v754_v20 = vpop.permute.xlu0 %753 }
 0x30c   : > { %v756_v23 = vpop.permute.xlu1 %755  ;;  %v802_v29 = vsel %vm519_vm8, %v744_v1, %v754_v20 }
 0x30d   : > { %852 = vrot.lane.b32.xlu1 %v802_v29, %s1039_s30  ;;  %v758_v36 = vsel %vm504_vm12, %v756_v23, %v1287_v56  ;;  %v757_v48 = vsel %vm504_vm12, %v754_v20, %v756_v23 }
 0x30e   : > { %848 = vrot.lane.b32.xlu0 %v796_v32, %s1039_s30  ;;  %v808_v54 = vsel %vm519_vm8, %v748_v41, %v758_v36  ;;  %v805_v34 = vsel %vm519_vm8, %v747_v38, %v757_v48 }
 0x30f   : > { %v762_v39 = vpop.permute.xlu0 %761 }
 0x310   : > { %v764_v55 = vpop.permute.xlu1 %763 }
 0x311   : > { %842 = vrot.lane.b32.xlu1 %v787_v44, %s1039_s30  ;;  %v765_v28 = vsel %vm516_vm14, %v762_v39, %v764_v55  ;;  %v766_v43 = vsel %vm516_vm14, %v764_v55, %v1306_v46 }
 0x312   : > { %856 = vrot.lane.b32.xlu0 %v808_v54, %s1039_s30 }
 0x313   : > { %v770_v56 = vpop.permute.xlu0 %769 }
 0x314   : > { %v772_v30 = vpop.permute.xlu1 %771  ;;  %v811_v59 = vsel %vm519_vm8, %v762_v39, %v770_v56 }
 0x315   : > { %v773_v58 = vsel %vm246_vm9, %v770_v56, %v772_v30  ;;  %850 = vrot.lane.b32.xlu1 %v799_v45, %s1039_s30  ;;  %v817_v5 = vsel %vm519_vm8, %v766_v43, %v772_v30 }
 0x316   : > { %v814_v33 = vsel %vm519_vm8, %v765_v28, %v773_v58 }
 0x317   : > { %860 = vrot.lane.b32.xlu0 %v814_v33, %s1039_s30 }
 0x319   : > { %854 = vrot.lane.b32.xlu1 %v805_v34, %s1039_s30 }
 0x31b   : > { %858 = vrot.lane.b32.xlu0 %v811_v59, %s1039_s30 }
 0x31d   : > { %862 = vrot.lane.b32.xlu1 %v817_v5, %s1039_s30 }
 0x36c   : > { %v835_v50 = vpop.permute.xlu0 %834  ;;  %v839_v49 = vpop.permute.xlu1 %838 }
 0x374   : > { %v845_v51 = vpop.permute.xlu0 %844  ;;  %v841_v52 = vpop.permute.xlu1 %840 }
 0x378   : > { %v837_v11 = vpop.permute.xlu0 %836 }
 0x379   : > { %v865_v61 = vsel %vm399_vm7, %v837_v11, %v839_v49  ;;  %v864_v62 = vsel %vm399_vm7, %v835_v50, %v837_v11 }
 0x37a   : > { %888 = vmatprep.subr.bf16.mxu1 %v865_v61 }
 0x37b   : > { %889 = vmatpush1.bf16.msra.mxu1 %v864_v62 }
 0x37c   : > { %v847_v60 = vpop.permute.xlu0 %846 }
 0x37f   : > { %v853_v12 = vpop.permute.xlu1 %852 }
 0x380   : > { %v849_v46 = vpop.permute.xlu0 %848 }
 0x381   : > { %v868_v8 = vsel %vm399_vm7, %v847_v60, %v849_v46 }
 0x383   : > { %v843_v16 = vpop.permute.xlu1 %842 }
 0x384   : > { %v857_v15 = vpop.permute.xlu0 %856  ;;  %v867_v22 = vsel %vm399_vm7, %v843_v16, %v845_v51  ;;  %v866_v0 = vsel %vm399_vm7, %v841_v52, %v843_v16 }
 0x385   : > { %890 = vmatprep.subr.bf16.mxu1 %v867_v22 }
 0x386   : > { %891 = vmatpush1.bf16.msra.mxu1 %v866_v0 }
 0x387   : > { %v851_v4 = vpop.permute.xlu1 %850 }
 0x388   : > { %v869_v27 = vsel %vm399_vm7, %v849_v46, %v851_v4 }
 0x389   : > { %v861_v35 = vpop.permute.xlu0 %860  ;;  %892 = vmatprep.subr.bf16.mxu1 %v869_v27 }
 0x38a   : > { %893 = vmatpush1.bf16.msra.mxu1 %v868_v8 }
 0x38b   : > { %v855_v25 = vpop.permute.xlu1 %854 }
 0x38c   : > { %v871_v24 = vsel %vm399_vm7, %v855_v25, %v857_v15  ;;  %v870_v3 = vsel %vm399_vm7, %v853_v12, %v855_v25 }
 0x38d   : > { %894 = vmatprep.subr.bf16.mxu1 %v871_v24  ;;  %v859_v9 = vpop.permute.xlu0 %858 }
 0x38e   : > { %895 = vmatpush1.bf16.msra.mxu1 %v870_v3  ;;  %v872_v42 = vsel %vm399_vm7, %v859_v9, %v861_v35 }
 0x38f   : > { %v863_v40 = vpop.permute.xlu1 %862 }
 0x390   : > { %v873_v10 = vsel %vm399_vm7, %v861_v35, %v863_v40 }
 0x391   : > { %896 = vmatprep.subr.bf16.mxu1 %v873_v10 }
 0x392   : > { %897 = vmatpush1.bf16.msra.mxu1 %v872_v42 }
 0x395   : > { %999 = vmatmul.mubr.msk.bf16.vlgmr.msra.gmra.mrb[0].mxu1 %vm884_vm0, %v818_v53 }
 0x468   : > { %v922_v6 = vpop.f32.mrb[0].mxu1 }
 0x469   : > { %929 = vst [vmem:[%s199_s19] sm:$0xff] %v922_v6  ;;  %v924_v26 = vpop.f32.mrb[1].mxu1 }
 0x46a   : > { %930 = vst [vmem:[%s199_s19 + $0x8] sm:$0xff] %v924_v26  ;;  %v926_v13 = vpop.f32.mrb[2].mxu1 }
 0x46b   : > { %v927_v63 = vpop.f32.mrb[3].mxu1 }
 0x46c PF: > { %s14_s15 = sadd.s32 1, %s1031_s15  }
 0x46d   : > { %p11_p4 = scmp.ge.s32.totalorder %s14_s15, 4  }
 0x46f   :  { %13 = sbr.rel (!%p11_p4) target bundleno = 1 (0x1), region = 66 }

</bundles_post_ra>
